<compile_context>
chip_gen: v6e
topology: v6e:2x2x1
jax: 0.10.0
libtpu: 0.0.40
codegen_flags: <defaults>
</compile_context>

<pallas_src>
import functools

import jax
import jax.numpy as jnp
from jax.experimental import pallas as pl
from jax.experimental.pallas import tpu as pltpu


# ----------------------------------------------------------------------------
# Kernel: one grid step = one chunk of Tc timesteps (recurrence is serial).
# ----------------------------------------------------------------------------
def _slstm_seq_kernel(x_ref, w_ref, prow_ref, sel_ref, state0_ref, memg0_ref,
                      hs_ref, state_ref, memg_ref, *, Tc, H):
    c = pl.program_id(0)

    @pl.when(c == 0)
    def _init():
        state_ref[...] = state0_ref[...]
        memg_ref[...] = memg0_ref[...]

    # Resident parameters (one load per chunk).
    w = w_ref[...]                       # (4*I + H, n_cols) fused gate weights
    sel = sel_ref[...]                   # (n_cols, 4*H) 0/1 gate membership
    bias = prow_ref[0:1, :]              # fused bias row (bx + bh)
    beta_c = prow_ref[1:2, :]            # per-column gate beta (pre-clipped)
    thr_c = prow_ref[2:3, :]             # per-column gate threshold
    beta_h = prow_ref[3:4, 0:H]          # hidden-gate beta (pre-clipped)
    thr_h = prow_ref[4:5, 0:H]           # hidden-gate threshold
    inv_pop = prow_ref[5:6, 0:4 * H]     # 1/pop per gate (repeated H lanes each)

    state = state_ref[...]               # (B, SW) packed [hidden|syn|mem_h|pad]
    memg = memg_ref[...]                 # (B, n_cols) fused gate membranes
    h = state[:, 0:H]
    syn = state[:, H:2 * H]
    memh = state[:, 2 * H:3 * H]

    hs_pieces = []
    for t in range(Tc):                  # static -> fully unrolled
        # One fused MXU matmul for all four gate encoders:
        #   [x_f|x_i|x_g|x_o|h_prev] @ W_comb + (b_x + b_h)
        z = jnp.concatenate([x_ref[t], h], axis=1)
        enc = jnp.dot(z, w, preferred_element_type=jnp.float32) + bias

        # snnTorch Leaky ("subtract" reset) for all gate populations at once.
        reset = (memg > thr_c).astype(jnp.float32)
        memg = beta_c * memg + enc - reset * thr_c
        spk = (memg > thr_c).astype(jnp.float32)

        # Population means on the otherwise-idle MXU: exact 0/1 spike counts
        # via the membership selector, scaled by 1/pop in f32 afterwards.
        means = jnp.dot(spk, sel, preferred_element_type=jnp.float32) * inv_pop
        f = jax.nn.sigmoid(means[:, 0:H])
        i = jax.nn.sigmoid(means[:, H:2 * H])
        g = jnp.tanh(means[:, 2 * H:3 * H])
        o = jax.nn.sigmoid(means[:, 3 * H:4 * H])

        syn = f * syn + i * g
        mem_h_in = o * jnp.tanh(syn)

        reset_h = (memh > thr_h).astype(jnp.float32)
        memh = beta_h * memh + mem_h_in - reset_h * thr_h
        h = (memh > thr_h).astype(jnp.float32)
        hs_pieces.append(h)

    # Lane-dense writebacks: one (B, Tc*H) hidden slab per chunk, one packed
    # (B, SW) state slab and one (B, n_cols) gate-membrane slab (resident).
    hs_ref[0] = hs_pieces[0] if Tc == 1 else jnp.concatenate(hs_pieces, axis=1)
    pad = state_ref.shape[1] - 3 * H
    pieces = [h, syn, memh]
    if pad:
        pieces.append(jnp.zeros((h.shape[0], pad), jnp.float32))
    state_ref[...] = jnp.concatenate(pieces, axis=1)
    memg_ref[...] = memg


# ----------------------------------------------------------------------------
# Wrapper-side parameter fusion (done once).
# ----------------------------------------------------------------------------
def build_fused_params(params, betas, thrs, input_size, hidden_size, pops):
    I, H = int(input_size), int(hidden_size)
    n_gates = 4
    pops = tuple(int(p) for p in pops)
    offs, off = [], 0
    for p in pops:
        offs.append(off)
        off += p
    total = off
    n_cols = max(128, ((total + 127) // 128) * 128)
    K = n_gates * I + H

    w = jnp.zeros((K, n_cols), jnp.float32)
    bias = jnp.zeros((n_cols,), jnp.float32)
    beta_cols = jnp.zeros((n_cols,), jnp.float32)
    thr_cols = jnp.full((n_cols,), 1e30, jnp.float32)   # padded cols never spike
    sel = jnp.zeros((n_cols, n_gates * H), jnp.float32)
    inv_pop = jnp.zeros((n_gates * H,), jnp.float32)

    wx = [params["WifT"], params["WiiT"], params["WigT"], params["WioT"]]
    wh = [params["WhfT"], params["WhiT"], params["WhgT"], params["WhoT"]]
    bx = [params["bif"], params["bii"], params["big"], params["bio"]]
    bh = [params["bhf"], params["bhi"], params["bhg"], params["bho"]]

    for g in range(n_gates):
        p, c0 = pops[g], offs[g]
        w = w.at[g * I:(g + 1) * I, c0:c0 + p].set(wx[g])
        w = w.at[n_gates * I:n_gates * I + H, c0:c0 + p].set(wh[g])
        bias = bias.at[c0:c0 + p].set((bx[g] + bh[g]).reshape(-1))
        beta_cols = beta_cols.at[c0:c0 + p].set(jnp.clip(betas[g], 0.0, 1.0))
        thr_cols = thr_cols.at[c0:c0 + p].set(thrs[g])
        sel = sel.at[c0:c0 + p, g * H:(g + 1) * H].set(1.0)
        inv_pop = inv_pop.at[g * H:(g + 1) * H].set(1.0 / float(p))

    prow = jnp.zeros((8, n_cols), jnp.float32)
    prow = prow.at[0, :].set(bias)
    prow = prow.at[1, :].set(beta_cols)
    prow = prow.at[2, :].set(thr_cols)
    prow = prow.at[3, 0:H].set(jnp.clip(betas[4], 0.0, 1.0))
    prow = prow.at[4, 0:H].set(thrs[4])
    prow = prow.at[5, 0:n_gates * H].set(inv_pop)

    return dict(w=w, prow=prow, sel=sel, n_cols=n_cols, total=total,
                offs=tuple(offs), pops=pops)


def _pick_chunk(T, H, max_chunk=16):
    divisors = [c for c in range(min(T, max_chunk), 0, -1) if T % c == 0]
    for c in divisors:
        if (c * H) % 128 == 0:
            return c                     # lane-dense hidden slab
    return divisors[0]


def _pack_gate_mems(mems4, fused):
    packed = jnp.concatenate(mems4, axis=1).astype(jnp.float32)
    padc = fused["n_cols"] - fused["total"]
    if padc:
        packed = jnp.pad(packed, ((0, 0), (0, padc)))
    return packed


# ----------------------------------------------------------------------------
# Public wrappers
# ----------------------------------------------------------------------------
def slstm_sequence_forward(xs, state, mems, fused, input_size, hidden_size,
                           chunk=None, max_chunk=16):
    """Run T timesteps inside one pallas_call (grid over time chunks)."""
    x1, x2, x3, x4 = xs                  # each (T, B, input_size)
    h0, syn0 = state
    memf, memi, memgg, memo, memh = mems
    T, B, I = x1.shape
    H = int(hidden_size)
    n_cols = fused["n_cols"]
    SW = max(128, ((3 * H + 127) // 128) * 128)   # packed-state lane width

    Tc = int(chunk) if chunk is not None else _pick_chunk(T, H, max_chunk)
    assert T % Tc == 0, f"T={T} must be divisible by chunk={Tc}"
    C = T // Tc

    x_packed = jnp.concatenate([x1, x2, x3, x4], axis=2).astype(jnp.float32)
    memg0 = _pack_gate_mems((memf, memi, memgg, memo), fused)
    state0 = jnp.concatenate([h0, syn0, memh], axis=1).astype(jnp.float32)
    if SW > 3 * H:
        state0 = jnp.pad(state0, ((0, 0), (0, SW - 3 * H)))

    kernel = functools.partial(_slstm_seq_kernel, Tc=Tc, H=H)

    hs_raw, state_f, memg_f = pl.pallas_call(
        kernel,
        grid=(C,),
        in_specs=[
            pl.BlockSpec((Tc, B, 4 * I), lambda c: (c, 0, 0)),    # x chunk
            pl.BlockSpec((4 * I + H, n_cols), lambda c: (0, 0)),  # fused weights
            pl.BlockSpec((8, n_cols), lambda c: (0, 0)),          # param rows
            pl.BlockSpec((n_cols, 4 * H), lambda c: (0, 0)),      # mean selector
            pl.BlockSpec((B, SW), lambda c: (0, 0)),              # initial state
            pl.BlockSpec((B, n_cols), lambda c: (0, 0)),          # initial memg
        ],
        out_specs=(
            pl.BlockSpec((1, B, Tc * H), lambda c: (c, 0, 0)),    # hidden slab
            pl.BlockSpec((B, SW), lambda c: (0, 0)),              # carried state
            pl.BlockSpec((B, n_cols), lambda c: (0, 0)),          # carried memg
        ),
        out_shape=(
            jax.ShapeDtypeStruct((C, B, Tc * H), jnp.float32),
            jax.ShapeDtypeStruct((B, SW), jnp.float32),
            jax.ShapeDtypeStruct((B, n_cols), jnp.float32),
        ),
        compiler_params=pltpu.CompilerParams(
            dimension_semantics=("arbitrary",)),  # serial recurrence over chunks
    )(x_packed, fused["w"], fused["prow"], fused["sel"], state0, memg0)

    hs = jnp.transpose(hs_raw.reshape(C, B, Tc, H), (0, 2, 1, 3)).reshape(T, B, H)
    hidden_f = state_f[:, 0:H]
    syn_f = state_f[:, H:2 * H]
    memh_f = state_f[:, 2 * H:3 * H]
    mems_f = tuple(memg_f[:, o:o + p]
                   for o, p in zip(fused["offs"], fused["pops"])) + (memh_f,)
    return hs, (hidden_f, syn_f), mems_f


def slstm_cell_forward(inputs, state, mems, fused, input_size, hidden_size):
    """Single SLSTM_cell.forward step (reuses the sequence kernel with T=1)."""
    xs = tuple(x[None] for x in inputs)
    hs, state_f, mems_f = slstm_sequence_forward(
        xs, state, mems, fused, input_size, hidden_size, chunk=1)
    return hs[0], state_f, mems_f


# ----------------------------------------------------------------------------
# Pure-JAX references (mirror the original per-gate torch math)
# ----------------------------------------------------------------------------
def _leaky(inp, mem, beta, thr):
    reset = (mem > thr).astype(jnp.float32)
    mem_new = jnp.clip(beta, 0.0, 1.0) * mem + inp - reset * thr
    spk = (mem_new > thr).astype(jnp.float32)
    return spk, mem_new


def slstm_cell_ref(inputs, state, mems, params, betas, thrs):
    x1, x2, x3, x4 = inputs
    h_prev, syn_prev = state
    memf, memi, memgg, memo, memh = mems

    def gate(x, wT, b, whT, bh, mem, idx):
        enc = x @ wT + b + h_prev @ whT + bh
        spk, mem_new = _leaky(enc, mem, betas[idx], thrs[idx])
        return jnp.mean(spk, axis=1, keepdims=True), mem_new

    mf, memf_n = gate(x1, params["WifT"], params["bif"], params["WhfT"], params["bhf"], memf, 0)
    mi, memi_n = gate(x2, params["WiiT"], params["bii"], params["WhiT"], params["bhi"], memi, 1)
    mg, memg_n = gate(x3, params["WigT"], params["big"], params["WhgT"], params["bhg"], memgg, 2)
    mo, memo_n = gate(x4, params["WioT"], params["bio"], params["WhoT"], params["bho"], memo, 3)

    f = jax.nn.sigmoid(mf)
    i = jax.nn.sigmoid(mi)
    g = jnp.tanh(mg)
    o = jax.nn.sigmoid(mo)
    syn = f * syn_prev + i * g
    mem_h_in = o * jnp.tanh(syn)
    hidden, memh_n = _leaky(mem_h_in, memh, betas[4], thrs[4])
    return hidden, (hidden, syn), (memf_n, memi_n, memg_n, memo_n, memh_n)


def slstm_sequence_ref(xs, state, mems, params, betas, thrs):
    x1, x2, x3, x4 = xs
    T = x1.shape[0]
    hs = []
    for t in range(T):
        hidden, (_, syn), mems = slstm_cell_ref(
            (x1[t], x2[t], x3[t], x4[t]), state, mems, params, betas, thrs)
        state = (hidden, syn)
        hs.append(hidden)
    return jnp.stack(hs, axis=0), state, mems


# ----------------------------------------------------------------------------
# Setup helpers
# ----------------------------------------------------------------------------
def _linear_params(key, in_f, out_f):
    """torch.nn.Linear-style init U(-1/sqrt(in), 1/sqrt(in)); quantized to
    multiples of 1/128 so kernel vs. reference spike comparisons are exact."""
    kw, kb = jax.random.split(key)
    bound = 1.0 / (in_f ** 0.5)
    w = jax.random.uniform(kw, (out_f, in_f), jnp.float32, -bound, bound)
    b = jax.random.uniform(kb, (out_f,), jnp.float32, -bound, bound)
    q = lambda a: jnp.round(a * 128.0) / 128.0
    return q(w), q(b)


if __name__ == "__main__":
    key = jax.random.PRNGKey(0)

    batch = 8
    input_size = 32
    hidden_size = 32
    # Encoder populations [forget, input, gate, output]. The kernel handles
    # arbitrary sizes; powers of two keep the population-mean test bit-exact.
    pops = (64, 32, 64, 32)
    T = 32

    keys = jax.random.split(key, 20)

    Wif, bif = _linear_params(keys[0], input_size, pops[0])
    Wii, bii = _linear_params(keys[1], input_size, pops[1])
    Wig, big = _linear_params(keys[2], input_size, pops[2])
    Wio, bio = _linear_params(keys[3], input_size, pops[3])
    Whf, bhf = _linear_params(keys[4], hidden_size, pops[0])
    Whi, bhi = _linear_params(keys[5], hidden_size, pops[1])
    Whg, bhg = _linear_params(keys[6], hidden_size, pops[2])
    Who, bho = _linear_params(keys[7], hidden_size, pops[3])

    params = dict(
        WifT=Wif.T, bif=bif[None, :], WiiT=Wii.T, bii=bii[None, :],
        WigT=Wig.T, big=big[None, :], WioT=Wio.T, bio=bio[None, :],
        WhfT=Whf.T, bhf=bhf[None, :], WhiT=Whi.T, bhi=bhi[None, :],
        WhgT=Whg.T, bhg=bhg[None, :], WhoT=Who.T, bho=bho[None, :],
    )

    # settings: betas / thresholds for [forget, input, gate, output, hidden]
    # (binary-exact values so clamp / decay arithmetic is reproducible).
    betas = jnp.array([0.875, 0.75, 0.8125, 0.9375, 0.6875], jnp.float32)
    thrs = jnp.array([0.5, 0.375, 0.625, 0.5, 0.3125], jnp.float32)

    fused = build_fused_params(params, betas, thrs, input_size, hidden_size, pops)

    # ---------------- single-step cell (matches SLSTM_cell.forward) ----------
    x1 = jax.random.bernoulli(keys[8], 0.3, (batch, input_size)).astype(jnp.float32)
    x2 = jax.random.bernoulli(keys[9], 0.3, (batch, input_size)).astype(jnp.float32)
    x3 = jax.random.bernoulli(keys[10], 0.3, (batch, input_size)).astype(jnp.float32)
    x4 = jax.random.bernoulli(keys[11], 0.3, (batch, input_size)).astype(jnp.float32)
    h_prev = jax.random.bernoulli(keys[12], 0.4, (batch, hidden_size)).astype(jnp.float32)
    syn_prev = 0.5 * jax.random.normal(keys[13], (batch, hidden_size), jnp.float32)

    # init_leaky(): all membrane states start at zero
    mems0 = tuple(jnp.zeros((batch, p), jnp.float32) for p in pops) + (
        jnp.zeros((batch, hidden_size), jnp.float32),)

    inputs = (x1, x2, x3, x4)
    state = (h_prev, syn_prev)

    hidden, (h_out, syn), new_mems = slstm_cell_forward(
        inputs, state, mems0, fused, input_size, hidden_size)
    jax.block_until_ready((hidden, syn))

    hidden_r, (_, syn_r), mems_r = slstm_cell_ref(
        inputs, state, mems0, params, betas, thrs)
    assert hidden.shape == (batch, hidden_size) and syn.shape == (batch, hidden_size)
    assert jnp.allclose(hidden, hidden_r, atol=1e-4)
    assert jnp.allclose(syn, syn_r, atol=1e-4, rtol=1e-4)
    for a, b in zip(new_mems, mems_r):
        assert a.shape == b.shape
        assert jnp.allclose(a, b, atol=1e-4, rtol=1e-4)

    # ------------- sequence: time-chunked grid inside one pallas_call --------
    xs = tuple(
        jax.random.bernoulli(keys[14 + j], 0.3, (T, batch, input_size)).astype(jnp.float32)
        for j in range(4))

    hs, (h_f, syn_f), mems_f = slstm_sequence_forward(
        xs, state, mems0, fused, input_size, hidden_size)
    jax.block_until_ready((hs, h_f, syn_f))

    hs_r, (h_fr, syn_fr), mems_fr = slstm_sequence_ref(
        xs, state, mems0, params, betas, thrs)
    assert hs.shape == (T, batch, hidden_size)
    assert jnp.allclose(hs, hs_r, atol=1e-4)
    assert jnp.allclose(h_f, h_fr, atol=1e-4)
    assert jnp.allclose(syn_f, syn_fr, atol=1e-4, rtol=1e-4)
    for a, b in zip(mems_f, mems_fr):
        assert a.shape == b.shape
        assert jnp.allclose(a, b, atol=1e-4, rtol=1e-4)

    print("KERNEL_OK")
</pallas_src>

<mosaic_0001>
module attributes {stable_mosaic.version = 11 : i64} {
  func.func @_slstm_seq_kernel(%arg0: i32, %arg1: memref<1x8x128xf32, #tpu.memory_space<vmem>>, %arg2: memref<160x256xf32, #tpu.memory_space<vmem>>, %arg3: memref<8x256xf32, #tpu.memory_space<vmem>>, %arg4: memref<256x128xf32, #tpu.memory_space<vmem>>, %arg5: memref<8x128xf32, #tpu.memory_space<vmem>>, %arg6: memref<8x256xf32, #tpu.memory_space<vmem>>, %arg7: memref<1x8x32xf32, #tpu.memory_space<vmem>>, %arg8: memref<8x128xf32, #tpu.memory_space<vmem>>, %arg9: memref<8x256xf32, #tpu.memory_space<vmem>>) attributes {dimension_semantics = [#tpu.dimension_semantics<arbitrary>], iteration_bounds = array<i64: 1>, scalar_prefetch = 0 : i64, scratch_operands = 0 : i64, tpu.core_type = #tpu.core_type<tc>, window_params = [{transform_indices = @transform_0, window_bounds = array<i64: 1, 8, 128>}, {pipeline_mode = #tpu.pipeline_mode<synchronous>, transform_indices = @transform_1, window_bounds = array<i64: 160, 256>}, {pipeline_mode = #tpu.pipeline_mode<synchronous>, transform_indices = @transform_2, window_bounds = array<i64: 8, 256>}, {pipeline_mode = #tpu.pipeline_mode<synchronous>, transform_indices = @transform_3, window_bounds = array<i64: 256, 128>}, {pipeline_mode = #tpu.pipeline_mode<synchronous>, transform_indices = @transform_4, window_bounds = array<i64: 8, 128>}, {pipeline_mode = #tpu.pipeline_mode<synchronous>, transform_indices = @transform_5, window_bounds = array<i64: 8, 256>}, {transform_indices = @transform_6, window_bounds = array<i64: 1, 8, 32>}, {pipeline_mode = #tpu.pipeline_mode<synchronous>, transform_indices = @transform_7, window_bounds = array<i64: 8, 128>}, {pipeline_mode = #tpu.pipeline_mode<synchronous>, transform_indices = @transform_8, window_bounds = array<i64: 8, 256>}]} {
    %c0_i32 = arith.constant 0 : i32
    %0 = arith.cmpi eq, %arg0, %c0_i32 : i32
    %1 = arith.extui %0 : i1 to i32
    %c0_i32_0 = arith.constant 0 : i32
    %2 = arith.cmpi ne, %1, %c0_i32_0 : i32
    scf.if %2 {
      %c0_30 = arith.constant 0 : index
      %c0_31 = arith.constant 0 : index
      %85 = vector.load %arg5[%c0_30, %c0_31] : memref<8x128xf32, #tpu.memory_space<vmem>>, vector<8x128xf32>
      %c0_32 = arith.constant 0 : index
      %c0_33 = arith.constant 0 : index
      %86 = vector.load %arg8[%c0_32, %c0_33] : memref<8x128xf32, #tpu.memory_space<vmem>>, vector<8x128xf32>
      tpu.vector_store %arg8[%c0_32, %c0_33], %85 {strides = array<i32>} : memref<8x128xf32, #tpu.memory_space<vmem>>, vector<8x128xf32>,
      %c0_34 = arith.constant 0 : index
      %c0_35 = arith.constant 0 : index
      %87 = vector.load %arg6[%c0_34, %c0_35] : memref<8x256xf32, #tpu.memory_space<vmem>>, vector<8x256xf32>
      %c0_36 = arith.constant 0 : index
      %c0_37 = arith.constant 0 : index
      %88 = vector.load %arg9[%c0_36, %c0_37] : memref<8x256xf32, #tpu.memory_space<vmem>>, vector<8x256xf32>
      tpu.vector_store %arg9[%c0_36, %c0_37], %87 {strides = array<i32>} : memref<8x256xf32, #tpu.memory_space<vmem>>, vector<8x256xf32>,
    } else {
    }
    %c0 = arith.constant 0 : index
    %c0_1 = arith.constant 0 : index
    %3 = vector.load %arg2[%c0, %c0_1] : memref<160x256xf32, #tpu.memory_space<vmem>>, vector<160x256xf32>
    %c0_2 = arith.constant 0 : index
    %c0_3 = arith.constant 0 : index
    %4 = vector.load %arg4[%c0_2, %c0_3] : memref<256x128xf32, #tpu.memory_space<vmem>>, vector<256x128xf32>
    %c0_4 = arith.constant 0 : index
    %c0_5 = arith.constant 0 : index
    %5 = vector.load %arg3[%c0_4, %c0_5] : memref<8x256xf32, #tpu.memory_space<vmem>>, vector<1x256xf32>
    %c1 = arith.constant 1 : index
    %c0_6 = arith.constant 0 : index
    %6 = vector.load %arg3[%c1, %c0_6] : memref<8x256xf32, #tpu.memory_space<vmem>>, vector<1x256xf32>
    %c2 = arith.constant 2 : index
    %c0_7 = arith.constant 0 : index
    %7 = vector.load %arg3[%c2, %c0_7] : memref<8x256xf32, #tpu.memory_space<vmem>>, vector<1x256xf32>
    %c3 = arith.constant 3 : index
    %c0_8 = arith.constant 0 : index
    %8 = vector.load %arg3[%c3, %c0_8] : memref<8x256xf32, #tpu.memory_space<vmem>>, vector<1x32xf32>
    %c4 = arith.constant 4 : index
    %c0_9 = arith.constant 0 : index
    %9 = vector.load %arg3[%c4, %c0_9] : memref<8x256xf32, #tpu.memory_space<vmem>>, vector<1x32xf32>
    %c5 = arith.constant 5 : index
    %c0_10 = arith.constant 0 : index
    %10 = vector.load %arg3[%c5, %c0_10] : memref<8x256xf32, #tpu.memory_space<vmem>>, vector<1x128xf32>
    %c0_11 = arith.constant 0 : index
    %c0_12 = arith.constant 0 : index
    %11 = vector.load %arg8[%c0_11, %c0_12] : memref<8x128xf32, #tpu.memory_space<vmem>>, vector<8x128xf32>
    %c0_13 = arith.constant 0 : index
    %c0_14 = arith.constant 0 : index
    %12 = vector.load %arg9[%c0_13, %c0_14] : memref<8x256xf32, #tpu.memory_space<vmem>>, vector<8x256xf32>
    %13 = vector.extract_strided_slice %11 {offsets = [0, 0], sizes = [8, 32], strides = [1, 1]} : vector<8x128xf32> to vector<8x32xf32>
    %14 = vector.extract_strided_slice %11 {offsets = [0, 32], sizes = [8, 32], strides = [1, 1]} : vector<8x128xf32> to vector<8x32xf32>
    %15 = vector.extract_strided_slice %11 {offsets = [0, 64], sizes = [8, 32], strides = [1, 1]} : vector<8x128xf32> to vector<8x32xf32>
    %c0_15 = arith.constant 0 : index
    %c0_16 = arith.constant 0 : index
    %c0_17 = arith.constant 0 : index
    %16 = vector.load %arg1[%c0_15, %c0_16, %c0_17] : memref<1x8x128xf32, #tpu.memory_space<vmem>>, vector<1x8x128xf32>
    %17 = vector.shape_cast %16 : vector<1x8x128xf32> to vector<8x128xf32>
    %18 = tpu.concatenate %17, %13 in 1 : vector<8x128xf32>, vector<8x32xf32> -> vector<8x160xf32>
    %cst = arith.constant dense<0.000000e+00> : vector<8x256xf32>
    %19 = tpu.matmul %18, %3, %cst {dimension_numbers = #tpu.dot_dimension_numbers<[1], [0], [0], [1], [0, 0, 1, 1], [], []>} : vector<8x160xf32>, vector<160x256xf32>, vector<8x256xf32> -> vector<8x256xf32>
    %20 = vector.broadcast %5 : vector<1x256xf32> to vector<8x256xf32>
    %21 = arith.addf %19, %20 : vector<8x256xf32>
    %22 = vector.broadcast %7 : vector<1x256xf32> to vector<8x256xf32>
    %23 = arith.cmpf ogt, %12, %22 : vector<8x256xf32>
    %24 = arith.extui %23 : vector<8x256xi1> to vector<8x256xi32>
    %25 = arith.sitofp %24 : vector<8x256xi32> to vector<8x256xf32>
    %26 = vector.broadcast %6 : vector<1x256xf32> to vector<8x256xf32>
    %27 = arith.mulf %26, %12 : vector<8x256xf32>
    %28 = arith.addf %27, %21 : vector<8x256xf32>
    %29 = vector.broadcast %7 : vector<1x256xf32> to vector<8x256xf32>
    %30 = arith.mulf %25, %29 : vector<8x256xf32>
    %31 = arith.subf %28, %30 : vector<8x256xf32>
    %32 = vector.broadcast %7 : vector<1x256xf32> to vector<8x256xf32>
    %33 = arith.cmpf ogt, %31, %32 : vector<8x256xf32>
    %34 = arith.extui %33 : vector<8x256xi1> to vector<8x256xi32>
    %35 = arith.sitofp %34 : vector<8x256xi32> to vector<8x256xf32>
    %cst_18 = arith.constant dense<0.000000e+00> : vector<8x128xf32>
    %36 = tpu.matmul %35, %4, %cst_18 {dimension_numbers = #tpu.dot_dimension_numbers<[1], [0], [0], [1], [0, 0, 1, 1], [], []>} : vector<8x256xf32>, vector<256x128xf32>, vector<8x128xf32> -> vector<8x128xf32>
    %37 = vector.broadcast %10 : vector<1x128xf32> to vector<8x128xf32>
    %38 = arith.mulf %36, %37 : vector<8x128xf32>
    %39 = vector.extract_strided_slice %38 {offsets = [0, 0], sizes = [8, 32], strides = [1, 1]} : vector<8x128xf32> to vector<8x32xf32>
    %40 = arith.negf %39 : vector<8x32xf32>
    %41 = math.exp %40 : vector<8x32xf32>
    %cst_19 = arith.constant 1.000000e+00 : f32
    %42 = vector.broadcast %cst_19 : f32 to vector<8x32xf32>
    %43 = arith.addf %42, %41 : vector<8x32xf32>
    %44 = arith.divf %42, %43 : vector<8x32xf32>
    %45 = vector.extract_strided_slice %38 {offsets = [0, 32], sizes = [8, 32], strides = [1, 1]} : vector<8x128xf32> to vector<8x32xf32>
    %46 = arith.negf %45 : vector<8x32xf32>
    %47 = math.exp %46 : vector<8x32xf32>
    %cst_20 = arith.constant 1.000000e+00 : f32
    %48 = vector.broadcast %cst_20 : f32 to vector<8x32xf32>
    %49 = arith.addf %48, %47 : vector<8x32xf32>
    %50 = arith.divf %48, %49 : vector<8x32xf32>
    %51 = vector.extract_strided_slice %38 {offsets = [0, 64], sizes = [8, 32], strides = [1, 1]} : vector<8x128xf32> to vector<8x32xf32>
    %52 = math.tanh %51 : vector<8x32xf32>
    %53 = vector.extract_strided_slice %38 {offsets = [0, 96], sizes = [8, 32], strides = [1, 1]} : vector<8x128xf32> to vector<8x32xf32>
    %54 = arith.negf %53 : vector<8x32xf32>
    %55 = math.exp %54 : vector<8x32xf32>
    %cst_21 = arith.constant 1.000000e+00 : f32
    %56 = vector.broadcast %cst_21 : f32 to vector<8x32xf32>
    %57 = arith.addf %56, %55 : vector<8x32xf32>
    %58 = arith.divf %56, %57 : vector<8x32xf32>
    %59 = arith.mulf %44, %14 : vector<8x32xf32>
    %60 = arith.mulf %50, %52 : vector<8x32xf32>
    %61 = arith.addf %59, %60 : vector<8x32xf32>
    %62 = math.tanh %61 : vector<8x32xf32>
    %63 = arith.mulf %58, %62 : vector<8x32xf32>
    %64 = vector.broadcast %9 : vector<1x32xf32> to vector<8x32xf32>
    %65 = arith.cmpf ogt, %15, %64 : vector<8x32xf32>
    %66 = arith.extui %65 : vector<8x32xi1> to vector<8x32xi32>
    %67 = arith.sitofp %66 : vector<8x32xi32> to vector<8x32xf32>
    %68 = vector.broadcast %8 : vector<1x32xf32> to vector<8x32xf32>
    %69 = arith.mulf %68, %15 : vector<8x32xf32>
    %70 = arith.addf %69, %63 : vector<8x32xf32>
    %71 = vector.broadcast %9 : vector<1x32xf32> to vector<8x32xf32>
    %72 = arith.mulf %67, %71 : vector<8x32xf32>
    %73 = arith.subf %70, %72 : vector<8x32xf32>
    %74 = vector.broadcast %9 : vector<1x32xf32> to vector<8x32xf32>
    %75 = arith.cmpf ogt, %73, %74 : vector<8x32xf32>
    %76 = arith.extui %75 : vector<8x32xi1> to vector<8x32xi32>
    %77 = arith.sitofp %76 : vector<8x32xi32> to vector<8x32xf32>
    %c0_22 = arith.constant 0 : index
    %c0_23 = arith.constant 0 : index
    %c0_24 = arith.constant 0 : index
    %78 = vector.load %arg7[%c0_22, %c0_23, %c0_24] : memref<1x8x32xf32, #tpu.memory_space<vmem>>, vector<1x8x32xf32>
    %79 = vector.shape_cast %78 : vector<1x8x32xf32> to vector<8x32xf32>
    %80 = vector.shape_cast %77 : vector<8x32xf32> to vector<1x8x32xf32>
    tpu.vector_store %arg7[%c0_22, %c0_23, %c0_24], %80 {strides = array<i32>} : memref<1x8x32xf32, #tpu.memory_space<vmem>>, vector<1x8x32xf32>,
    %cst_25 = arith.constant 0.000000e+00 : f32
    %81 = vector.broadcast %cst_25 : f32 to vector<8x32xf32>
    %82 = tpu.concatenate %77, %61, %73, %81 in 1 : vector<8x32xf32>, vector<8x32xf32>, vector<8x32xf32>, vector<8x32xf32> -> vector<8x128xf32>
    %c0_26 = arith.constant 0 : index
    %c0_27 = arith.constant 0 : index
    %83 = vector.load %arg8[%c0_26, %c0_27] : memref<8x128xf32, #tpu.memory_space<vmem>>, vector<8x128xf32>
    tpu.vector_store %arg8[%c0_26, %c0_27], %82 {strides = array<i32>} : memref<8x128xf32, #tpu.memory_space<vmem>>, vector<8x128xf32>,
    %c0_28 = arith.constant 0 : index
    %c0_29 = arith.constant 0 : index
    %84 = vector.load %arg9[%c0_28, %c0_29] : memref<8x256xf32, #tpu.memory_space<vmem>>, vector<8x256xf32>
    tpu.vector_store %arg9[%c0_28, %c0_29], %31 {strides = array<i32>} : memref<8x256xf32, #tpu.memory_space<vmem>>, vector<8x256xf32>,
    return
  }
  func.func @transform_0(%arg0: i32) -> (i32, i32, i32) {
    %c0_i32 = arith.constant 0 : i32
    %c0_i32_0 = arith.constant 0 : i32
    %c0_i32_1 = arith.constant 0 : i32
    return %arg0, %c0_i32, %c0_i32_0 : i32, i32, i32
  }
  func.func @transform_1(%arg0: i32) -> (i32, i32) {
    %c0_i32 = arith.constant 0 : i32
    %c0_i32_0 = arith.constant 0 : i32
    %c0_i32_1 = arith.constant 0 : i32
    return %c0_i32, %c0_i32_0 : i32, i32
  }
  func.func @transform_2(%arg0: i32) -> (i32, i32) {
    %c0_i32 = arith.constant 0 : i32
    %c0_i32_0 = arith.constant 0 : i32
    %c0_i32_1 = arith.constant 0 : i32
    return %c0_i32, %c0_i32_0 : i32, i32
  }
  func.func @transform_3(%arg0: i32) -> (i32, i32) {
    %c0_i32 = arith.constant 0 : i32
    %c0_i32_0 = arith.constant 0 : i32
    %c0_i32_1 = arith.constant 0 : i32
    return %c0_i32, %c0_i32_0 : i32, i32
  }
  func.func @transform_4(%arg0: i32) -> (i32, i32) {
    %c0_i32 = arith.constant 0 : i32
    %c0_i32_0 = arith.constant 0 : i32
    %c0_i32_1 = arith.constant 0 : i32
    return %c0_i32, %c0_i32_0 : i32, i32
  }
  func.func @transform_5(%arg0: i32) -> (i32, i32) {
    %c0_i32 = arith.constant 0 : i32
    %c0_i32_0 = arith.constant 0 : i32
    %c0_i32_1 = arith.constant 0 : i32
    return %c0_i32, %c0_i32_0 : i32, i32
  }
  func.func @transform_6(%arg0: i32) -> (i32, i32, i32) {
    %c0_i32 = arith.constant 0 : i32
    %c0_i32_0 = arith.constant 0 : i32
    %c0_i32_1 = arith.constant 0 : i32
    return %arg0, %c0_i32, %c0_i32_0 : i32, i32, i32
  }
  func.func @transform_7(%arg0: i32) -> (i32, i32) {
    %c0_i32 = arith.constant 0 : i32
    %c0_i32_0 = arith.constant 0 : i32
    %c0_i32_1 = arith.constant 0 : i32
    return %c0_i32, %c0_i32_0 : i32, i32
  }
  func.func @transform_8(%arg0: i32) -> (i32, i32) {
    %c0_i32 = arith.constant 0 : i32
    %c0_i32_0 = arith.constant 0 : i32
    %c0_i32_1 = arith.constant 0 : i32
    return %c0_i32, %c0_i32_0 : i32, i32
  }
}

</mosaic_0001>

<bundles_post_ra>
// kernel: tpu_custom_call.1
= control target key start
LH: loop header
LB: loop body
LE: loop exit
PB: predicated region body
PF: predicated region fallthrough
CT: control target
= control target key end

     0   :  { %14 = vsyncpa [#allocation3], 0  ;;  %s879_s0 = inlined_call_operand.hbm [shape: f32[1,8,128], index: 0, kind: input, shape index: {}]   ;;  %s880_s1 = inlined_call_operand.hbm [shape: f32[160,256], index: 1, kind: input, shape index: {}]   ;;  %s881_s2 = inlined_call_operand.hbm [shape: f32[8,256], index: 2, kind: input, shape index: {}]   ;;  %s882_s3 = inlined_call_operand.hbm [shape: f32[256,128], index: 3, kind: input, shape index: {}]   ;;  %s883_s4 = inlined_call_operand.hbm [shape: f32[8,128], index: 4, kind: input, shape index: {}]   ;;  %s884_s5 = inlined_call_operand.hbm [shape: f32[8,256], index: 5, kind: input, shape index: {}]   ;;  %s885_s6 = inlined_call_operand.hbm [shape: f32[1,8,32], index: 6, kind: output, shape index: {0}]   ;;  %s886_s7 = inlined_call_operand.hbm [shape: f32[8,128], index: 7, kind: output, shape index: {1}]   ;;  %s887_s8 = inlined_call_operand.hbm [shape: f32[8,256], index: 8, kind: output, shape index: {2}]  }
   0x1   :  { %15 = vsyncpa [#allocation6], 0 }
   0x2   :  { %16 = vsyncpa [#allocation9], 0 }
   0x3   :  { %17 = vsyncpa [#allocation12], 0 }
   0x4   :  { %18 = vsyncpa [#allocation4], 0 }
   0x5   :  { %19 = vsyncpa [#allocation15], 0  ;;  %s772_s27 = smov [#allocation5]  }
   0x6   :  { %s35_s28 = sshll.u32 %s772_s27, 4  ;;  %s36_s28 = int_to_ptr.vmem [resolvable:$true] %s35_s28 }
   0x7   :  { %s588_s29 = scalar_lea.vmem %s36_s28, 5120  ;;  %p593_p1 = scmp.lt.s32.totalorder %s36_s28, %s36_s28 }
   0x8   :  { %p589_p0 = scmp.ne.s32.totalorder %s36_s28, %s588_s29  ;;  %p594_p2 = scmp.lt.s32.totalorder %s588_s29, %s588_s29 }
   0xa   :  { %p595_p3 = por %p594_p2, %p593_p1 }
   0xc   :  { %p596_p4 = pnand %p595_p3, %p589_p0 }
   0xe   :  { %599 = shalt.err (!%p596_p4)
}
   0xf   :  { %s773_s30 = smov 256   ;;  %s774_s9 = smov 16  }
  0x10   :  { %41 = dma.hbm_to_vmem [thread:$0]  %s880_s1, 5120, %s36_s28, [#allocation6], %s773_s30, %s773_s30, %s774_s9  }
  0x11   :  { %s775_s12 = smov [#allocation8]  }
  0x12   :  { %s57_s13 = sshll.u32 %s775_s12, 4  ;;  %s58_s13 = int_to_ptr.vmem [resolvable:$true] %s57_s13 }
  0x13   :  { %s608_s14 = scalar_lea.vmem %s58_s13, 4096  ;;  %p613_p6 = scmp.lt.s32.totalorder %s58_s13, %s58_s13 }
  0x14   :  { %p609_p5 = scmp.ne.s32.totalorder %s58_s13, %s608_s14  ;;  %p614_p7 = scmp.lt.s32.totalorder %s608_s14, %s608_s14 }
  0x16   :  { %p615_p8 = por %p614_p7, %p613_p6 }
  0x18   :  { %p616_p9 = pnand %p615_p8, %p609_p5 }
  0x1a   :  { %619 = shalt.err (!%p616_p9)
}
  0x1b   :  { %s776_s15 = smov 128   ;;  %s777_s16 = smov 8  }
  0x1c   :  { %63 = dma.hbm_to_vmem [thread:$0]  %s882_s3, 4096, %s58_s13, [#allocation9], %s776_s15, %s776_s15, %s777_s16  }
  0x1d   :  { %s778_s19 = smov [#allocation2]   ;;  %s779_s21 = smov [#allocation7]  }
  0x1e   :  { %s26_s20 = sshll.u32 %s778_s19, 4  ;;  %s48_s1 = sshll.u32 %s779_s21, 4  ;;  %s27_s20 = int_to_ptr.vmem [resolvable:$true] %s26_s20  ;;  %s49_s1 = int_to_ptr.vmem [resolvable:$true] %s48_s1 }
  0x1f   :  { %s628_s22 = scalar_lea.vmem %s27_s20, 128  ;;  %p633_p11 = scmp.lt.s32.totalorder %s27_s20, %s27_s20 }
  0x20   :  { %p629_p10 = scmp.ne.s32.totalorder %s27_s20, %s628_s22  ;;  %p634_p12 = scmp.lt.s32.totalorder %s628_s22, %s628_s22 }
  0x22   :  { %p635_p13 = por %p634_p12, %p633_p11 }
  0x24   :  { %p636_p0 = pnand %p635_p13, %p629_p10 }
  0x26   :  { %639 = shalt.err (!%p636_p0)
}
  0x27   :  { %29 = dma.hbm_to_vmem [thread:$0]  %s879_s0, 128, %s27_s20, [#allocation3]  }
  0x28   :  { %s648_s25 = scalar_lea.vmem %s49_s1, 256  ;;  %p653_p2 = scmp.lt.s32.totalorder %s49_s1, %s49_s1 }
  0x29   :  { %p649_p1 = scmp.ne.s32.totalorder %s49_s1, %s648_s25  ;;  %p654_p3 = scmp.lt.s32.totalorder %s648_s25, %s648_s25 }
  0x2b   :  { %p655_p4 = por %p654_p3, %p653_p2 }
  0x2d   :  { %p656_p5 = pnand %p655_p4, %p649_p1 }
  0x2f   :  { %659 = shalt.err (!%p656_p5)
}
  0x30   :  { %51 = dma.hbm_to_vmem [thread:$0]  %s881_s2, 256, %s49_s1, [#allocation6]  }
  0x31   :  { %s780_s27 = smov [#allocation10]   ;;  %s781_s29 = smov [#allocation11]  }
  0x32   :  { %s70_s28 = sshll.u32 %s780_s27, 4  ;;  %s80_s30 = sshll.u32 %s781_s29, 4  ;;  %s71_s28 = int_to_ptr.vmem [resolvable:$true] %s70_s28  ;;  %s81_s30 = int_to_ptr.vmem [resolvable:$true] %s80_s30 }
  0x33   :  { %s668_s9 = scalar_lea.vmem %s71_s28, 128  ;;  %p673_p7 = scmp.lt.s32.totalorder %s71_s28, %s71_s28 }
  0x34   :  { %p669_p6 = scmp.ne.s32.totalorder %s71_s28, %s668_s9  ;;  %p674_p8 = scmp.lt.s32.totalorder %s668_s9, %s668_s9 }
  0x36   :  { %p675_p9 = por %p674_p8, %p673_p7 }
  0x38   :  { %p676_p10 = pnand %p675_p9, %p669_p6 }
  0x3a   :  { %679 = shalt.err (!%p676_p10)
}
  0x3b   :  { %73 = dma.hbm_to_vmem [thread:$0]  %s883_s4, 128, %s71_s28, [#allocation9]  }
  0x3c   :  { %s688_s11 = scalar_lea.vmem %s81_s30, 256  ;;  %p693_p12 = scmp.lt.s32.totalorder %s81_s30, %s81_s30 }
  0x3d   :  { %p689_p11 = scmp.ne.s32.totalorder %s81_s30, %s688_s11  ;;  %p694_p13 = scmp.lt.s32.totalorder %s688_s11, %s688_s11 }
  0x3f   :  { %p695_p0 = por %p694_p13, %p693_p12 }
  0x41   :  { %p696_p1 = pnand %p695_p0, %p689_p11 }
  0x43   :  { %699 = shalt.err (!%p696_p1)
}
  0x44   :  { %83 = dma.hbm_to_vmem [thread:$0]  %s884_s5, 256, %s81_s30, [#allocation12]  }
  0x45   :  { %760 = dma.done.wait [#allocation3], 128  }
  0x46   :  { %761 = vsyncadd [#allocation3], 4294967168 }
  0x47   :  { %762 = dma.done.wait [#allocation6], 5376  }
  0x48   :  { %763 = vsyncadd [#allocation6], 4294961920 }
  0x49   :  { %764 = dma.done.wait [#allocation9], 4224  }
  0x4a   :  { %765 = vsyncadd [#allocation9], 4294963072 }
  0x4b   :  { %766 = dma.done.wait [#allocation12], 256  }
  0x4c   :  { %767 = vsyncadd [#allocation12], 4294967040  ;;  %v143_v0 = vld [vmem:[#allocation5 + $0xf8] sm:$0xff]  ;;  %v142_v1 = vld [vmem:[#allocation5 + $0xf0] sm:$0xff]  ;;  %vm207_vm0 = vcmask 261120   ;;  %s784_s4 = smov 96  }
  0x4d   :  { %v141_v2 = vld [vmem:[#allocation5 + $0xe8] sm:$0xff]  ;;  %211 = vmatprep.subr.mxu0 %v143_v0  ;;  %v140_v3 = vld [vmem:[#allocation5 + $0xe0] sm:$0xff]  ;;  %v139_v4 = vld [vmem:[#allocation5 + $0xd8] sm:$0xff]  ;;  %s785_s5 = smov 64   ;;  %s786_s13 = smov 32  }
  0x4e   :  { %212 = vmatpush1.msra.mxu0 %v142_v1  ;;  %v138_v5 = vld [vmem:[#allocation5 + $0xd0] sm:$0xff]  ;;  %v137_v6 = vld [vmem:[#allocation5 + $0xc8] sm:$0xff]  ;;  %v136_v7 = vld [vmem:[#allocation5 + $0xc0] sm:$0xff]  ;;  %s787_s14 = smov [#allocation13]  }
  0x4f   :  { %213 = vmatprep.subr.mxu0 %v141_v2  ;;  %v135_v8 = vld [vmem:[#allocation5 + $0xb8] sm:$0xff]  ;;  %v134_v9 = vld [vmem:[#allocation5 + $0xb0] sm:$0xff]  ;;  %v133_v10 = vld [vmem:[#allocation5 + $0xa8] sm:$0xff]  ;;  %s470_s15 = sshll.u32 %s787_s14, 4  ;;  %s471_s15 = int_to_ptr.vmem [resolvable:$true] %s470_s15 }
  0x50   :  { %214 = vmatpush1.msra.mxu0 %v140_v3  ;;  %v132_v11 = vld [vmem:[#allocation5 + $0xa0] sm:$0xff]  ;;  %v131_v12 = vld [vmem:[#allocation5 + $0x98] sm:$0xff]  ;;  %v130_v13 = vld [vmem:[#allocation5 + $0x90] sm:$0xff]  ;;  %s700_s16 = scalar_lea.vmem %s471_s15, 128  ;;  %p705_p3 = scmp.lt.s32.totalorder %s471_s15, %s471_s15 }
  0x51   :  { %215 = vmatprep.subr.mxu0 %v139_v4  ;;  %v129_v14 = vld [vmem:[#allocation5 + $0x88] sm:$0xff]  ;;  %v128_v15 = vld [vmem:[#allocation5 + $0x80] sm:$0xff]  ;;  %v127_v16 = vld [vmem:[#allocation5 + $0x78] sm:$0xff]  ;;  %p701_p2 = scmp.ne.s32.totalorder %s471_s15, %s700_s16  ;;  %p706_p4 = scmp.lt.s32.totalorder %s700_s16, %s700_s16 }
  0x52   :  { %216 = vmatpush1.msra.mxu0 %v138_v5  ;;  %v853_v17 = vld [vmem:[#allocation10] sm:$0xff]  ;;  %v183_v18 = vld [vmem:[#allocation8 + $0xf8] sm:$0xff]  ;;  %v182_v20 = vld [vmem:[#allocation8 + $0xf0] sm:$0xff] }
  0x53   :  { %217 = vmatprep.subr.mxu0 %v137_v6  ;;  %509 = vmatprep.mubr.msk.f32.mxu0 %vm207_vm0, %v853_v17  ;;  %v167_v19 = vld [vmem:[#allocation8 + $0x78] sm:$0xff]  ;;  %v126_v21 = vld [vmem:[#allocation5 + $0x70] sm:$0xff]  ;;  %v166_v22 = vld [vmem:[#allocation8 + $0x70] sm:$0xff]  ;;  %p707_p5 = por %p706_p4, %p705_p3 }
  0x54   :  { %218 = vmatpush1.msra.mxu0 %v136_v7  ;;  %519 = vmatprep.subr.mxu1 %v183_v18  ;;  %v125_v23 = vld [vmem:[#allocation5 + $0x68] sm:$0xff]  ;;  %v181_v24 = vld [vmem:[#allocation8 + $0xe8] sm:$0xff]  ;;  %v124_v25 = vld [vmem:[#allocation5 + $0x60] sm:$0xff] }
  0x55   :  { %219 = vmatprep.subr.mxu0 %v135_v8  ;;  %520 = vmatpush3.msra.mxu1 %v167_v19  ;;  %v165_v26 = vld [vmem:[#allocation8 + $0x68] sm:$0xff]  ;;  %v180_v28 = vld [vmem:[#allocation8 + $0xe0] sm:$0xff]  ;;  %v121_v31 = vld [vmem:[#allocation5 + $0x48] sm:$0xff]  ;;  %p708_p6 = pnand %p707_p5, %p701_p2 }
  0x56   :  { %220 = vmatpush1.msra.mxu0 %v134_v9  ;;  %521 = vmatprep.subr.mxu1 %v182_v20  ;;  %v123_v27 = vld [vmem:[#allocation5 + $0x58] sm:$0xff]  ;;  %v122_v29 = vld [vmem:[#allocation5 + $0x50] sm:$0xff]  ;;  %v179_v32 = vld [vmem:[#allocation8 + $0xd8] sm:$0xff] }
  0x57   :  { %221 = vmatprep.subr.mxu0 %v133_v10  ;;  %522 = vmatpush3.msra.mxu1 %v166_v22  ;;  %v164_v30 = vld [vmem:[#allocation8 + $0x60] sm:$0xff]  ;;  %v120_v33 = vld [vmem:[#allocation5 + $0x40] sm:$0xff]  ;;  %v163_v34 = vld [vmem:[#allocation8 + $0x58] sm:$0xff]  ;;  %v197_v10 = vlaneseq }
  0x58   :  { %222 = vmatpush1.msra.mxu0 %v132_v11  ;;  %523 = vmatprep.subr.mxu1 %v181_v24  ;;  %v119_v35 = vld [vmem:[#allocation5 + $0x38] sm:$0xff]  ;;  %v178_v36 = vld [vmem:[#allocation8 + $0xd0] sm:$0xff]  ;;  %v118_v37 = vld [vmem:[#allocation5 + $0x30] sm:$0xff] }
  0x59   :  { %223 = vmatprep.subr.mxu0 %v131_v12  ;;  %524 = vmatpush3.msra.mxu1 %v165_v26  ;;  %v162_v38 = vld [vmem:[#allocation8 + $0x50] sm:$0xff]  ;;  %v117_v39 = vld [vmem:[#allocation5 + $0x28] sm:$0xff]  ;;  %v177_v40 = vld [vmem:[#allocation8 + $0xc8] sm:$0xff]  ;;  %v198_v11 = vshrl.u32 %v197_v10, 7 }
  0x5a   :  { %224 = vmatpush1.msra.mxu0 %v130_v13  ;;  %525 = vmatprep.subr.mxu1 %v180_v28  ;;  %v116_v41 = vld [vmem:[#allocation5 + $0x20] sm:$0xff]  ;;  %v161_v42 = vld [vmem:[#allocation8 + $0x48] sm:$0xff]  ;;  %v176_v44 = vld [vmem:[#allocation8 + $0xc0] sm:$0xff] }
  0x5b   :  { %225 = vmatprep.subr.mxu0 %v129_v14  ;;  %526 = vmatpush3.msra.mxu1 %v164_v30  ;;  %v115_v43 = vld [vmem:[#allocation5 + $0x18] sm:$0xff]  ;;  %v114_v45 = vld [vmem:[#allocation5 + $0x10] sm:$0xff]  ;;  %v113_v47 = vld [vmem:[#allocation5 + $0x8] sm:$0xff]  ;;  %v199_v12 = vsub.s32 0, %v198_v11  ;;  %v203_v14 = vsub.s32 1, %v198_v11 }
  0x5c   :  { %226 = vmatpush1.msra.mxu0 %v128_v15  ;;  %527 = vmatprep.subr.mxu1 %v179_v32  ;;  %v160_v46 = vld [vmem:[#allocation8 + $0x40] sm:$0xff]  ;;  %v175_v48 = vld [vmem:[#allocation8 + $0xb8] sm:$0xff]  ;;  %v112_v49 = vld [vmem:[#allocation5] sm:$0xff] }
  0x5d   :  { %227 = vmatprep.subr.mxu0 %v127_v16  ;;  %528 = vmatpush3.msra.mxu1 %v163_v34  ;;  %v159_v50 = vld [vmem:[#allocation8 + $0x38] sm:$0xff]  ;;  %v151_v51 = vld [vmem:[#allocation5 + $0x138] sm:$0xff]  ;;  %v174_v52 = vld [vmem:[#allocation8 + $0xb0] sm:$0xff] }
  0x5e   :  { %228 = vmatpush1.msra.mxu0 %v126_v21  ;;  %529 = vmatprep.subr.mxu1 %v178_v36  ;;  %v150_v53 = vld [vmem:[#allocation5 + $0x130] sm:$0xff]  ;;  %v158_v54 = vld [vmem:[#allocation8 + $0x30] sm:$0xff]  ;;  %v149_v55 = vld [vmem:[#allocation5 + $0x128] sm:$0xff] }
  0x5f   :  { %229 = vmatprep.subr.mxu0 %v125_v23  ;;  %530 = vmatpush3.msra.mxu1 %v162_v38  ;;  %v173_v56 = vld [vmem:[#allocation8 + $0xa8] sm:$0xff]  ;;  %v148_v57 = vld [vmem:[#allocation5 + $0x120] sm:$0xff]  ;;  %v146_v59 = vld [vmem:[#allocation5 + $0x110] sm:$0xff] }
  0x60   :  { %230 = vmatpush1.msra.mxu0 %v124_v25  ;;  %531 = vmatprep.subr.mxu1 %v177_v40  ;;  %v147_v58 = vld [vmem:[#allocation5 + $0x118] sm:$0xff]  ;;  %v145_v60 = vld [vmem:[#allocation5 + $0x108] sm:$0xff]  ;;  %v144_v61 = vld [vmem:[#allocation5 + $0x100] sm:$0xff]  ;;  %v782_v25 = vmov 0.0  }
  0x61   :  { %231 = vmatprep.subr.mxu0 %v123_v27  ;;  %532 = vmatpush3.msra.mxu1 %v161_v42  ;;  %v195_v62 = vld [vmem:[#allocation2] sm:$0xff]  ;;  %v172_v0 = vld [vmem:[#allocation8 + $0xa0] sm:$0xff]  ;;  %v171_v2 = vld [vmem:[#allocation8 + $0x98] sm:$0xff] }
  0x62   :  { %232 = vmatpush1.msra.mxu0 %v122_v29  ;;  %533 = vmatprep.subr.mxu1 %v176_v44  ;;  %v157_v63 = vld [vmem:[#allocation8 + $0x28] sm:$0xff]  ;;  %v156_v1 = vld [vmem:[#allocation8 + $0x20] sm:$0xff]  ;;  %v155_v3 = vld [vmem:[#allocation8 + $0x18] sm:$0xff] }
  0x63   :  { %233 = vmatprep.subr.mxu0 %v121_v31  ;;  %534 = vmatpush3.msra.mxu1 %v160_v46  ;;  %v170_v4 = vld [vmem:[#allocation8 + $0x90] sm:$0xff]  ;;  %v169_v6 = vld [vmem:[#allocation8 + $0x88] sm:$0xff]  ;;  %v168_v8 = vld [vmem:[#allocation8 + $0x80] sm:$0xff] }
  0x64   :  { %234 = vmatpush1.msra.mxu0 %v120_v33  ;;  %535 = vmatprep.subr.mxu1 %v175_v48  ;;  %v154_v5 = vld [vmem:[#allocation8 + $0x10] sm:$0xff]  ;;  %v153_v7 = vld [vmem:[#allocation8 + $0x8] sm:$0xff]  ;;  %v152_v9 = vld [vmem:[#allocation8] sm:$0xff] }
  0x65   :  { %235 = vmatprep.subr.mxu0 %v119_v35  ;;  %536 = vmatpush3.msra.mxu1 %v159_v50  ;;  %v188_v13 = vld [vmem:[#allocation7 + $0x2] ss:$8 sm:$0x3]  ;;  %v108_v16 = vld [vmem:[#allocation11] sm:$0xff] }
  0x66   :  { %236 = vmatpush1.msra.mxu0 %v118_v37  ;;  %537 = vmatprep.subr.mxu1 %v174_v52  ;;  %v286_v15 = vrot.slane %v188_v13, %v199_v12  ;;  %v186_v18 = vld [vmem:[#allocation7 + $0x1] ss:$8 sm:$0x3]  ;;  %v290_v19 = vrot.slane %v188_v13, %v203_v14  ;;  %v184_v20 = vld [vmem:[#allocation7] ss:$8 sm:$0x3] }
  0x67   :  { %237 = vmatprep.subr.mxu0 %v117_v39  ;;  %538 = vmatpush3.msra.mxu1 %v158_v54  ;;  %v109_v21 = vld [vmem:[#allocation11 + $0x8] sm:$0xff]  ;;  %v303_v22 = vrot.slane %v186_v18, %v199_v12  ;;  %v200_v23 = vrot.slane %v184_v20, %v199_v12  ;;  %v307_v24 = vrot.slane %v186_v18, %v203_v14 }
  0x68   :  { %238 = vmatpush1.msra.mxu0 %v116_v41  ;;  %539 = vmatprep.subr.mxu1 %v173_v56  ;;  %vm293_vm1 = vcmp.gt.f32.partialorder %v108_v16, %v286_v15  ;;  %vm294_vm2 = vcmp.gt.f32.partialorder %v109_v21, %v290_v19  ;;  %v204_v28 = vrot.slane %v184_v20, %v203_v14  ;;  %v783_v41 = vmov 1.0  }
  0x69   :  { %239 = vmatprep.subr.mxu0 %v115_v43  ;;  %540 = vmatpush3.msra.mxu1 %v157_v63  ;;  %v510_v26 = vsel %vm293_vm1, 1.0, %v782_v25  ;;  %v310_v27 = vmul.f32 %v303_v22, %v108_v16  ;;  %v511_v30 = vsel %vm294_vm2, 1.0, %v782_v25  ;;  %v311_v33 = vmul.f32 %v307_v24, %v109_v21  ;;  %v191_v43 = vld [vmem:[#allocation7 + $0x5] ss:$0 sm:$0xff] }
  0x6a   :  { %240 = vmatpush1.msra.mxu0 %v114_v45  ;;  %541 = vmatprep.subr.mxu1 %v172_v0  ;;  %v314_v32 = vmul.f32 %v510_v26, %v286_v15  ;;  %v315_v37 = vmul.f32 %v511_v30, %v290_v19 }
  0x6b   :  { %241 = vmatprep.subr.mxu0 %v113_v47  ;;  %542 = vmatpush3.msra.mxu1 %v156_v1  ;;  %v189_v1 = vld [vmem:[#allocation7 + $0x3] ss:$0 sm:$0xff] }
  0x6c   :  { %242 = vmatpush1.msra.mxu0 %v112_v49  ;;  %543 = vmatprep.subr.mxu1 %v171_v2 }
  0x6d   :  { %267 = vmatprep.subr.mxu0 %v151_v51  ;;  %544 = vmatpush3.msra.mxu1 %v155_v3  ;;  %v190_v51 = vld [vmem:[#allocation7 + $0x4] ss:$0 sm:$0xff] }
  0x6e   :  { %268 = vmatpush2.msra.mxu0 %v150_v53  ;;  %545 = vmatprep.subr.mxu1 %v170_v4 }
  0x6f   :  { %269 = vmatprep.subr.mxu0 %v149_v55  ;;  %546 = vmatpush3.msra.mxu1 %v154_v5 }
  0x70   :  { %270 = vmatpush2.msra.mxu0 %v148_v57  ;;  %547 = vmatprep.subr.mxu1 %v169_v6 }
  0x71   :  { %271 = vmatprep.subr.mxu0 %v147_v58  ;;  %548 = vmatpush3.msra.mxu1 %v153_v7 }
  0x72   :  { %272 = vmatpush2.msra.mxu0 %v146_v59  ;;  %549 = vmatprep.subr.mxu1 %v168_v8 }
  0x73   :  { %273 = vmatprep.subr.mxu0 %v145_v60  ;;  %550 = vmatpush3.msra.mxu1 %v152_v9 }
  0x74   :  { %274 = vmatpush2.msra.mxu0 %v144_v61 }
  0x75   :  { %276 = vmatmul.mubr.f32.vlgmr.msra.gmra.mxu0 %v195_v62 }
 0x135   :  { %v277_v29 = vpop.f32.mrf.mxu0 }
 0x136   :  { %v278_v31 = vadd.f32 %v277_v29, %v200_v23 }
 0x137   :  { %v279_v34 = vpop.f32.mrf.mxu0 }
 0x138   :  { %v312_v35 = vadd.f32 %v310_v27, %v278_v31  ;;  %v280_v36 = vadd.f32 %v279_v34, %v204_v28 }
 0x13a   :  { %v316_v38 = vsub.f32 %v312_v35, %v314_v32  ;;  %v313_v39 = vadd.f32 %v311_v33, %v280_v36 }
 0x13c   :  { %462 = vst [vmem:[#allocation16] sm:$0xff] %v316_v38  ;;  %v317_v40 = vsub.f32 %v313_v39, %v315_v37  ;;  %vm318_vm4 = vcmp.gt.f32.partialorder %v316_v38, %v286_v15 }
 0x13e   :  { %vm319_vm3 = vcmp.gt.f32.partialorder %v317_v40, %v290_v19  ;;  %463 = vst [vmem:[#allocation16 + $0x8] sm:$0xff] %v317_v40 }
 0x13f   :  { %514 = vmatprep.mubr.msk.f32.mxu1 %vm319_vm3, %v783_v41 }
 0x140   :  { %515 = vmatmul.mubr.msk.f32.vlgmr.msra.gmra.mxu1 %vm318_vm4, %v783_v41 }
 0x200   :  { %v551_v42 = vpop.f32.mrf.mxu1 }
 0x202   :  { %v552_v44 = vpop.f32.mrf.mxu1 }
 0x203   :  { %v553_v45 = vadd.f32 %v552_v44, %v551_v42 }
 0x205   :  { %v394_v46 = vmul.f32 %v553_v45, %v191_v43 }
 0x207   :  { %572 = vtanh.f32 %v394_v46  ;;  %v516_v48 = vmul.f32 -1.442695, %v394_v46 }
 0x209   :  { %574 = vpow2.f32 %v516_v48 }
 0x214   :  { %v573_v47 = vpop.eup %572 }
 0x215   :  { %407 = vrot.lane.b32.xlu0 %v573_v47, %s784_s4 }
 0x216   :  { %v575_v49 = vpop.eup %574 }
 0x217   :  { %v398_v50 = vadd.f32 1.0, %v575_v49 }
 0x219   :  { %402 = vrot.lane.b32.xlu0 %v853_v17, %s784_s4  ;;  %576 = vrcp.f32 %v398_v50 }
 0x21d   :  { %423 = vrot.lane.b32.xlu0 %v190_v51, %s785_s5 }
 0x226   :  { %v577_v52 = vpop.eup %576 }
 0x287   :  { %v408_v53 = vpop.permute.xlu0 %407 }
 0x288   :  { %v410_v54 = vmul.f32 %v577_v52, %v408_v53 }
 0x28a   :  { %412 = vrot.lane.b32.xlu1 %v410_v54, %s784_s4 }
 0x28b   :  { %v403_v55 = vpop.permute.xlu0 %402 }
 0x28c   :  { %v405_v56 = vmul.f32 %v577_v52, %v403_v55 }
 0x28f   :  { %v424_v59 = vpop.permute.xlu0 %423 }
 0x290   :  { %vm426_vm5 = vcmp.gt.f32.partialorder %v853_v17, %v424_v59 }
 0x291   :  { %v517_v61 = vsel %vm426_vm5, 1.0, %v782_v25 }
 0x292   :  { %v438_v62 = vmul.f32 %v517_v61, %v424_v59 }
 0x2fc   :  { %v413_v57 = vpop.permute.xlu1 %412 }
 0x2fd   :  { %v415_v58 = vadd.f32 %v413_v57, %v405_v56 }
 0x2ff   :  { %578 = vtanh.f32 %v415_v58 }
 0x30c   :  { %v579_v60 = vpop.eup %578 }
 0x30d   :  { %418 = vrot.lane.b32.xlu1 %v579_v60, %s784_s4 }
 0x311   :  { %429 = vrot.lane.b32.xlu1 %v853_v17, %s785_s5 }
 0x315   :  { %440 = vrot.lane.b32.xlu1 %v438_v62, %s785_s5 }
 0x37f   :  { %v419_v63 = vpop.permute.xlu1 %418 }
 0x380   :  { %v421_v0 = vmul.f32 %v577_v52, %v419_v63 }
 0x382   :  { %434 = vrot.lane.b32.xlu0 %v421_v0, %s786_s13 }
 0x383   :  { %v430_v2 = vpop.permute.xlu1 %429 }
 0x384   :  { %v432_v3 = vmul.f32 %v430_v2, %v189_v1 }
 0x386   :  { %449 = vrot.lane.b32.xlu0 %v415_v58, %s786_s13 }
 0x387   :  { %v441_v6 = vpop.permute.xlu1 %440 }
 0x3f4   :  { %v435_v4 = vpop.permute.xlu0 %434 }
 0x3f5   :  { %v437_v5 = vadd.f32 %v435_v4, %v432_v3 }
 0x3f7   :  { %v443_v7 = vsub.f32 %v437_v5, %v441_v6 }
 0x3f9   :  { %vm444_vm6 = vcmp.gt.f32.partialorder %v443_v7, %v190_v51  ;;  %453 = vrot.lane.b32.xlu1 %v443_v7, %s785_s5 }
 0x3fa   :  { %v518_v17 = vsel %vm444_vm6, 1.0, %v782_v25 }
 0x3fb   :  { %447 = vst.msk [vmem:[#allocation13] sm:$0xff] %vm207_vm0, %v518_v17 }
 0x3fc   :  { %711 = shalt.err (!%p708_p6)
}
 0x3fd   :  { %473 = dma.vmem_to_hbm [thread:$0]  %s471_s15, 128, %s885_s6, [#allocation4]   ;;  %vm457_vm7 = vcmask 523264   ;;  %v450_v8 = vpop.permute.xlu0 %449  ;;  %vm459_vm8 = vcmask 785408  }
 0x3fe   :  { %s788_s19 = smov [#allocation14]   ;;  %s789_s21 = smov [#allocation16]   ;;  %v456_v9 = vsel %vm207_vm0, %v518_v17, %v450_v8 }
 0x3ff   :  { %s480_s20 = sshll.u32 %s788_s19, 4  ;;  %s490_s1 = sshll.u32 %s789_s21, 4  ;;  %s481_s20 = int_to_ptr.vmem [resolvable:$true] %s480_s20  ;;  %s491_s1 = int_to_ptr.vmem [resolvable:$true] %s490_s1 }
 0x400   :  { %s720_s22 = scalar_lea.vmem %s481_s20, 128  ;;  %p725_p8 = scmp.lt.s32.totalorder %s481_s20, %s481_s20 }
 0x401   :  { %p721_p7 = scmp.ne.s32.totalorder %s481_s20, %s720_s22  ;;  %p726_p9 = scmp.lt.s32.totalorder %s720_s22, %s720_s22 }
 0x403   :  { %p727_p10 = por %p726_p9, %p725_p8 }
 0x405   :  { %p728_p11 = pnand %p727_p10, %p721_p7 }
 0x46b   :  { %v454_v10 = vpop.permute.xlu1 %453 }
 0x46c   :  { %v458_v11 = vsel %vm457_vm7, %v456_v9, %v454_v10 }
 0x46d   :  { %v460_v12 = vsel %vm459_vm8, %v458_v11, 0.0 }
 0x46e   :  { %461 = vst [vmem:[#allocation14] sm:$0xff] %v460_v12 }
 0x46f   :  { %731 = shalt.err (!%p728_p11)
}
 0x470   :  { %483 = dma.vmem_to_hbm [thread:$0]  %s481_s20, 128, %s886_s7, [#allocation15]  }
 0x471   :  { %s740_s24 = scalar_lea.vmem %s491_s1, 256  ;;  %p745_p13 = scmp.lt.s32.totalorder %s491_s1, %s491_s1 }
 0x472   :  { %p741_p12 = scmp.ne.s32.totalorder %s491_s1, %s740_s24  ;;  %p746_p0 = scmp.lt.s32.totalorder %s740_s24, %s740_s24 }
 0x474   :  { %p747_p1 = por %p746_p0, %p745_p13 }
 0x476   :  { %p748_p2 = pnand %p747_p1, %p741_p12 }
 0x478   :  { %751 = shalt.err (!%p748_p2)
}
 0x479   :  { %493 = dma.vmem_to_hbm [thread:$0]  %s491_s1, 256, %s887_s8, [#allocation15]  }
 0x47a   :  { %768 = dma.done.wait [#allocation4], 128  }
 0x47b   :  { %769 = vsyncadd [#allocation4], 4294967168 }
 0x47c   :  { %770 = dma.done.wait [#allocation15], 384  }
 0x47d   :  { %771 = vsyncadd [#allocation15], 4294966912 }
 0x47e   :  { %503 = vsyncpa [#allocation3], 1 }
 0x47f   :  { %504 = vsyncpa [#allocation6], 1 }
 0x480   :  { %505 = vsyncpa [#allocation9], 1 }
 0x481   :  { %506 = vsyncpa [#allocation12], 1 }
 0x482   :  { %507 = vsyncpa [#allocation4], 1 }
 0x483   :  { %508 = vsyncpa [#allocation15], 1 }

</bundles_post_ra>
